<compile_context>
chip_gen: v6e
topology: v6e:2x2x1
jax: 0.10.0
libtpu: 0.0.40
codegen_flags: <defaults>
</compile_context>

<pallas_src>
import functools

import jax
import jax.numpy as jnp
from jax.experimental import pallas as pl
from jax.experimental.pallas import tpu as pltpu


def _conv_tile_kernel(x_ref, t_ref, b_ref, o_ref, *, TH, K, per_tap_rows,
                      apply_relu):
    """One (batch, row-tile) grid step.

    x_ref : stride==1: (1, 1, TH+K-1, Wp*Cin)  halo'd row slab (bf16)
            stride>1 : (1, 1, K, TH, Wp*Cin)   per-tap row slabs (bf16)
    t_ref : (K, Wp*Cin, Wo*Cout)   banded conv weight matrices (bf16)
    b_ref : (1, Wo*Cout)           lane-dense bias (f32)
    o_ref : (1, TH, Wo*Cout)       lane-dense output tile
    """
    acc = None
    for kh in range(K):
        if per_tap_rows:
            rows = x_ref[0, 0, kh, :, :]              # (TH, Wp*Cin)
        else:
            rows = x_ref[0, 0, pl.ds(kh, TH), :]      # (TH, Wp*Cin), static start
        part = jnp.dot(rows, t_ref[kh],
                       preferred_element_type=jnp.float32)   # (TH, Wo*Cout)
        acc = part if acc is None else acc + part
    # Lane-dense f32 epilogue (bias pre-tiled to Wo*Cout lanes in the wrapper).
    acc = acc + b_ref[...]
    if apply_relu:
        acc = jnp.maximum(acc, 0.0)
    # Lane-dense store (unmasked when Wo*Cout is a multiple of 128).
    o_ref[0] = acc.astype(o_ref.dtype)


def _pick_row_tile(Ho, Wo, Cout, max_acc_bytes=4 << 20):
    """Largest multiple-of-8 row tile dividing Ho whose f32 accumulator
    (TH x Wo*Cout) stays under ~4 MiB.  Bigger tiles = fewer ~0.35us grid
    steps and a larger MXU M dimension; no '>=2 tiles' preference (the batch
    axis provides megacore parallelism)."""
    best = None
    for t in range(8, Ho + 1, 8):
        if Ho % t == 0 and t * Wo * Cout * 4 <= max_acc_bytes:
            best = t
    return best if best is not None else Ho   # unaligned fallback (still correct)


def _banded_weights(weight, Wp, Wo, K, stride, dtype):
    """(Cout, Cin, K, K) -> (K, Wp*Cin, Wo*Cout) banded matrices with
    T[kh, wi*Cin+ci, wo*Cout+co] = weight[co, ci, kh, wi - wo*stride]
    (zero outside the K-wide band).  Encodes the column stride, so the kernel
    never does a strided / gathered lane access."""
    wt = jnp.transpose(weight, (2, 3, 1, 0)).astype(jnp.float32)   # (K,K,Cin,Cout)
    wi = jnp.arange(Wp)
    wo = jnp.arange(Wo)
    kw = jnp.arange(K)
    sel = (wi[None, :, None] == (wo[None, None, :] * stride + kw[:, None, None]))
    sel = sel.astype(jnp.float32)                                  # (K, Wp, Wo)
    t = jnp.einsum('kpw,hkio->hpiwo', sel, wt)                     # (K,Wp,Cin,Wo,Cout)
    K_, Wp_, Cin_, Wo_, Cout_ = t.shape
    return t.reshape(K_, Wp_ * Cin_, Wo_ * Cout_).astype(dtype)


def conv_layer_incr_forward_nhwc(x_nhwc, weight, bias, *, stride=1, padding=None,
                                 activation="relu",
                                 compute_dtype=jnp.bfloat16):
    """ConvLayerIncr forward (norm=None path), NHWC in / NHWC out."""
    N, H, W, Cin = x_nhwc.shape
    Cout, Cin_w, K, K2 = weight.shape
    assert Cin_w == Cin and K2 == K
    if padding is None:
        padding = K // 2
    Ho = (H + 2 * padding - K) // stride + 1
    Wo = (W + 2 * padding - K) // stride + 1
    out_dtype = x_nhwc.dtype

    if activation not in (None, "relu"):
        # TODO(synk): other torch activations (nnReservedActivation wraps any
        # torch fn) are not implemented here.
        raise NotImplementedError(activation)
    # TODO(synk): norm='BN' (nnBatchNorm2dIncr) path of ConvLayerIncr is not
    # implemented (module default is norm=None -> conv + bias + relu only).

    # Lane-dense packing: fuse (W, Cin) on the lane axis.
    x_pad = jnp.pad(x_nhwc.astype(compute_dtype),
                    ((0, 0), (padding, padding), (padding, padding), (0, 0)))
    Hp, Wp = x_pad.shape[1], x_pad.shape[2]
    x_fused = x_pad.reshape(N, Hp, Wp * Cin)

    TH = _pick_row_tile(Ho, Wo, Cout)
    R = Ho // TH
    assert R * TH == Ho
    TH_in = (TH - 1) * stride + K

    # Halo'd row slabs -> bounded per-step input VMEM footprint (auto
    # double-buffered by BlockSpec).  stride>1 uses per-tap row slabs so the
    # row stride is also resolved in the wrapper (no strided in-kernel reads).
    # TODO(synk): at very large images the halo duplication (~(K-1)/TH extra
    # rows) could be avoided with memory_space=pl.ANY + manual halo'd slab DMA.
    if stride == 1:
        if R == 1:
            x_slab = x_fused[:, None, :TH_in, :]                  # (N,1,TH_in,Wp*Cin)
        else:
            ridx = (jnp.arange(R)[:, None] * TH
                    + jnp.arange(TH_in)[None, :])                 # (R, TH_in)
            x_slab = x_fused[:, ridx, :]                          # (N,R,TH_in,Wp*Cin)
        slab_block = (1, 1, TH_in, Wp * Cin)
        per_tap_rows = False
    else:
        ridx = (jnp.arange(R)[:, None, None] * (TH * stride)
                + jnp.arange(K)[None, :, None]
                + jnp.arange(TH)[None, None, :] * stride)         # (R, K, TH)
        x_slab = x_fused[:, ridx, :]                              # (N,R,K,TH,Wp*Cin)
        slab_block = (1, 1, K, TH, Wp * Cin)
        per_tap_rows = True

    t_mat = _banded_weights(weight, Wp, Wo, K, stride, compute_dtype)
    b_lane = jnp.tile(bias.astype(jnp.float32), (Wo,)).reshape(1, Wo * Cout)

    kernel = functools.partial(_conv_tile_kernel, TH=TH, K=K,
                               per_tap_rows=per_tap_rows,
                               apply_relu=(activation == "relu"))

    ndim_slab = len(slab_block)

    def slab_index_map(n, r):
        return (n, r) + (0,) * (ndim_slab - 2)

    # Explicit scoped-VMEM budget: 2x (double-buffered) blocks + headroom.
    cbytes = jnp.dtype(compute_dtype).itemsize
    in_block_bytes = (TH_in if stride == 1 else K * TH) * Wp * Cin * cbytes
    w_bytes = K * Wp * Cin * Wo * Cout * cbytes
    b_bytes = Wo * Cout * 4
    out_block_bytes = TH * Wo * Cout * jnp.dtype(out_dtype).itemsize
    vmem_limit = int(min(100 << 20,
                         2 * (in_block_bytes + w_bytes + b_bytes + out_block_bytes)
                         + (8 << 20)))

    out_fused = pl.pallas_call(
        kernel,
        out_shape=jax.ShapeDtypeStruct((N, Ho, Wo * Cout), out_dtype),
        grid_spec=pltpu.PrefetchScalarGridSpec(
            num_scalar_prefetch=0,
            grid=(N, R),
            in_specs=[
                pl.BlockSpec(slab_block, slab_index_map),
                pl.BlockSpec((K, Wp * Cin, Wo * Cout), lambda n, r: (0, 0, 0)),
                pl.BlockSpec((1, Wo * Cout), lambda n, r: (0, 0)),
            ],
            out_specs=pl.BlockSpec((1, TH, Wo * Cout), lambda n, r: (n, r, 0)),
        ),
        compiler_params=pltpu.CompilerParams(
            # Batch "parallel" (one image per TensorCore on 2-TC chips), row
            # axis "arbitrary" so megacore sharding never duplicates input DMA.
            dimension_semantics=("parallel", "arbitrary"),
            vmem_limit_bytes=vmem_limit),
    )(x_slab, t_mat, b_lane)

    return out_fused.reshape(N, Ho, Wo, Cout)


def conv_layer_incr_forward(x_nchw, weight, bias, *, stride=1, padding=None,
                            activation="relu", compute_dtype=jnp.bfloat16):
    """PyTorch-compat wrapper: NCHW in / NCHW out (transposes only live here;
    keep NHWC end-to-end across layers to avoid these extra HBM passes)."""
    x_nhwc = jnp.transpose(x_nchw, (0, 2, 3, 1))
    out_nhwc = conv_layer_incr_forward_nhwc(
        x_nhwc, weight, bias, stride=stride, padding=padding,
        activation=activation, compute_dtype=compute_dtype)
    return jnp.transpose(out_nhwc, (0, 3, 1, 2))


def _reference_forward(x_nchw, weight, bias, *, stride=1, padding=None,
                       activation="relu", compute_dtype=jnp.bfloat16):
    K = weight.shape[2]
    if padding is None:
        padding = K // 2
    out = jax.lax.conv_general_dilated(
        x_nchw.astype(compute_dtype), weight.astype(compute_dtype),
        window_strides=(stride, stride),
        padding=[(padding, padding), (padding, padding)],
        dimension_numbers=("NCHW", "OIHW", "NCHW"),
        preferred_element_type=jnp.float32,
    ).astype(jnp.float32)
    out = out + bias.reshape(1, -1, 1, 1)
    if activation == "relu":
        out = jnp.maximum(out, 0.0)
    return out.astype(x_nchw.dtype)


if __name__ == "__main__":
    # Small shapes consistent with the module: batch=2, Cin=4, spatial=16,
    # Cout=8, kernel_size=3, padding=1, activation='relu', norm=None.
    key = jax.random.PRNGKey(0)
    kx, kw, kb = jax.random.split(key, 3)

    N, Cin, H, W = 2, 4, 16, 16
    Cout, K = 8, 3

    x = jax.random.normal(kx, (N, Cin, H, W), dtype=jnp.float32)
    weight = jax.random.normal(kw, (Cout, Cin, K, K), dtype=jnp.float32) * 0.1
    bias = jax.random.normal(kb, (Cout,), dtype=jnp.float32) * 0.1

    # stride=1 (module default).
    out = conv_layer_incr_forward(x, weight, bias, stride=1, activation="relu")
    out = jax.block_until_ready(out)
    ref = _reference_forward(x, weight, bias, stride=1, activation="relu")
    assert out.shape == (N, Cout, H, W)
    assert jnp.allclose(out, ref, atol=2e-3, rtol=2e-3), float(
        jnp.max(jnp.abs(out - ref)))

    # stride=2 (per-tap row slabs; column stride folded into the banded weights).
    out2 = conv_layer_incr_forward(x, weight, bias, stride=2, activation="relu")
    out2 = jax.block_until_ready(out2)
    ref2 = _reference_forward(x, weight, bias, stride=2, activation="relu")
    assert out2.shape == ref2.shape
    assert jnp.allclose(out2, ref2, atol=2e-3, rtol=2e-3), float(
        jnp.max(jnp.abs(out2 - ref2)))

    print("KERNEL_OK")
</pallas_src>

<mosaic_0001>
module attributes {stable_mosaic.version = 11 : i64} {
  func.func @_conv_tile_kernel(%arg0: i32, %arg1: i32, %arg2: memref<1x1x18x72xbf16, #tpu.memory_space<vmem>>, %arg3: memref<3x72x128xbf16, #tpu.memory_space<vmem>>, %arg4: memref<1x128xf32, #tpu.memory_space<vmem>>, %arg5: memref<1x16x128xf32, #tpu.memory_space<vmem>>) attributes {dimension_semantics = [#tpu.dimension_semantics<parallel>, #tpu.dimension_semantics<arbitrary>], iteration_bounds = array<i64: 2, 1>, scalar_prefetch = 0 : i64, scratch_operands = 0 : i64, tpu.core_type = #tpu.core_type<tc>, window_params = [{transform_indices = @transform_0, window_bounds = array<i64: 1, 1, 18, 72>}, {pipeline_mode = #tpu.pipeline_mode<synchronous>, transform_indices = @transform_1, window_bounds = array<i64: 3, 72, 128>}, {pipeline_mode = #tpu.pipeline_mode<synchronous>, transform_indices = @transform_2, window_bounds = array<i64: 1, 128>}, {transform_indices = @transform_3, window_bounds = array<i64: 1, 16, 128>}]} {
    %c0 = arith.constant 0 : index
    %c0_0 = arith.constant 0 : index
    %c0_1 = arith.constant 0 : index
    %c0_2 = arith.constant 0 : index
    %0 = vector.load %arg2[%c0, %c0_0, %c0_1, %c0_2] : memref<1x1x18x72xbf16, #tpu.memory_space<vmem>>, vector<1x1x16x72xbf16>
    %1 = vector.shape_cast %0 : vector<1x1x16x72xbf16> to vector<16x72xbf16>
    %c0_3 = arith.constant 0 : index
    %c0_4 = arith.constant 0 : index
    %c0_5 = arith.constant 0 : index
    %2 = vector.load %arg3[%c0_3, %c0_4, %c0_5] : memref<3x72x128xbf16, #tpu.memory_space<vmem>>, vector<1x72x128xbf16>
    %3 = vector.shape_cast %2 : vector<1x72x128xbf16> to vector<72x128xbf16>
    %cst = arith.constant dense<0.000000e+00> : vector<16x128xf32>
    %4 = tpu.matmul %1, %3, %cst {dimension_numbers = #tpu.dot_dimension_numbers<[1], [0], [0], [1], [0, 0, 1, 1], [], []>} : vector<16x72xbf16>, vector<72x128xbf16>, vector<16x128xf32> -> vector<16x128xf32>
    %c0_6 = arith.constant 0 : index
    %c0_7 = arith.constant 0 : index
    %c1 = arith.constant 1 : index
    %c0_8 = arith.constant 0 : index
    %5 = vector.load %arg2[%c0_6, %c0_7, %c1, %c0_8] : memref<1x1x18x72xbf16, #tpu.memory_space<vmem>>, vector<1x1x16x72xbf16>
    %6 = vector.shape_cast %5 : vector<1x1x16x72xbf16> to vector<16x72xbf16>
    %c1_9 = arith.constant 1 : index
    %c0_10 = arith.constant 0 : index
    %c0_11 = arith.constant 0 : index
    %7 = vector.load %arg3[%c1_9, %c0_10, %c0_11] : memref<3x72x128xbf16, #tpu.memory_space<vmem>>, vector<1x72x128xbf16>
    %8 = vector.shape_cast %7 : vector<1x72x128xbf16> to vector<72x128xbf16>
    %cst_12 = arith.constant dense<0.000000e+00> : vector<16x128xf32>
    %9 = tpu.matmul %6, %8, %cst_12 {dimension_numbers = #tpu.dot_dimension_numbers<[1], [0], [0], [1], [0, 0, 1, 1], [], []>} : vector<16x72xbf16>, vector<72x128xbf16>, vector<16x128xf32> -> vector<16x128xf32>
    %10 = arith.addf %4, %9 : vector<16x128xf32>
    %c0_13 = arith.constant 0 : index
    %c0_14 = arith.constant 0 : index
    %c2 = arith.constant 2 : index
    %c0_15 = arith.constant 0 : index
    %11 = vector.load %arg2[%c0_13, %c0_14, %c2, %c0_15] : memref<1x1x18x72xbf16, #tpu.memory_space<vmem>>, vector<1x1x16x72xbf16>
    %12 = vector.shape_cast %11 : vector<1x1x16x72xbf16> to vector<16x72xbf16>
    %c2_16 = arith.constant 2 : index
    %c0_17 = arith.constant 0 : index
    %c0_18 = arith.constant 0 : index
    %13 = vector.load %arg3[%c2_16, %c0_17, %c0_18] : memref<3x72x128xbf16, #tpu.memory_space<vmem>>, vector<1x72x128xbf16>
    %14 = vector.shape_cast %13 : vector<1x72x128xbf16> to vector<72x128xbf16>
    %cst_19 = arith.constant dense<0.000000e+00> : vector<16x128xf32>
    %15 = tpu.matmul %12, %14, %cst_19 {dimension_numbers = #tpu.dot_dimension_numbers<[1], [0], [0], [1], [0, 0, 1, 1], [], []>} : vector<16x72xbf16>, vector<72x128xbf16>, vector<16x128xf32> -> vector<16x128xf32>
    %16 = arith.addf %10, %15 : vector<16x128xf32>
    %c0_20 = arith.constant 0 : index
    %c0_21 = arith.constant 0 : index
    %17 = vector.load %arg4[%c0_20, %c0_21] : memref<1x128xf32, #tpu.memory_space<vmem>>, vector<1x128xf32>
    %18 = vector.broadcast %17 : vector<1x128xf32> to vector<16x128xf32>
    %19 = arith.addf %16, %18 : vector<16x128xf32>
    %cst_22 = arith.constant 0.000000e+00 : f32
    %20 = vector.broadcast %cst_22 : f32 to vector<16x128xf32>
    %21 = arith.maximumf %19, %20 : vector<16x128xf32>
    %c0_23 = arith.constant 0 : index
    %c0_24 = arith.constant 0 : index
    %c0_25 = arith.constant 0 : index
    %22 = vector.load %arg5[%c0_23, %c0_24, %c0_25] : memref<1x16x128xf32, #tpu.memory_space<vmem>>, vector<1x16x128xf32>
    %23 = vector.shape_cast %22 : vector<1x16x128xf32> to vector<16x128xf32>
    %24 = vector.shape_cast %21 : vector<16x128xf32> to vector<1x16x128xf32>
    tpu.vector_store %arg5[%c0_23, %c0_24, %c0_25], %24 {strides = array<i32>} : memref<1x16x128xf32, #tpu.memory_space<vmem>>, vector<1x16x128xf32>,
    return
  }
  func.func @transform_0(%arg0: i32, %arg1: i32) -> (i32, i32, i32, i32) {
    %c0_i32 = arith.constant 0 : i32
    %c0_i32_0 = arith.constant 0 : i32
    %c0_i32_1 = arith.constant 0 : i32
    return %arg0, %arg1, %c0_i32, %c0_i32_0 : i32, i32, i32, i32
  }
  func.func @transform_1(%arg0: i32, %arg1: i32) -> (i32, i32, i32) {
    %c0_i32 = arith.constant 0 : i32
    %c0_i32_0 = arith.constant 0 : i32
    %c0_i32_1 = arith.constant 0 : i32
    %c0_i32_2 = arith.constant 0 : i32
    return %c0_i32, %c0_i32_0, %c0_i32_1 : i32, i32, i32
  }
  func.func @transform_2(%arg0: i32, %arg1: i32) -> (i32, i32) {
    %c0_i32 = arith.constant 0 : i32
    %c0_i32_0 = arith.constant 0 : i32
    %c0_i32_1 = arith.constant 0 : i32
    return %c0_i32, %c0_i32_0 : i32, i32
  }
  func.func @transform_3(%arg0: i32, %arg1: i32) -> (i32, i32, i32) {
    %c0_i32 = arith.constant 0 : i32
    %c0_i32_0 = arith.constant 0 : i32
    return %arg0, %arg1, %c0_i32 : i32, i32, i32
  }
}

</mosaic_0001>

<bundles_post_ra>
// kernel: tpu_custom_call.1
= control target key start
LH: loop header
LB: loop body
LE: loop exit
PB: predicated region body
PF: predicated region fallthrough
CT: control target
= control target key end

     0   :  { %8 = vsyncpa [#allocation3], 0  ;;  %s1118_s0 = inlined_call_operand.vmem [shape: bf16[2,1,18,72], index: 0, kind: input, shape index: {}]   ;;  %s1119_s1 = inlined_call_operand.hbm [shape: bf16[3,72,128], index: 1, kind: input, shape index: {}]   ;;  %s1120_s2 = inlined_call_operand.vmem [shape: f32[1,128], index: 2, kind: input, shape index: {}]   ;;  %s1121_s3 = inlined_call_operand.hbm [shape: f32[2,16,128], index: 3, kind: output, shape index: {}]  }
   0x1   :  { %9 = vsyncpa [#allocation4], 0 }
   0x2   :  { %11 = vsyncpa [#allocation4 + $0x1], 0  ;;  %s947_s12 = smov 0   ;;  %s949_s13 = smov 0  }
   0x3   :  { %s951_s14 = smov 0   ;;  %s953_s15 = smov 0  }
   0x4   :  { %s955_s16 = smov 0   ;;  %s957_s17 = smov 0  }
   0x5 LB: > { %s623_s18 = sadd.s32 4294967295, %s917_s17   ;;  %s624_s19 = sadd.s32 4294967294, %s917_s17   ;;  %s917_s17 = sphi %s957_s17, %s17_s17   ;;  %s913_s16 = sphi %s955_s16, %s1130_s16   ;;  %s909_s15 = sphi %s953_s15, %s1129_s15   ;;  %s905_s14 = sphi %s951_s14, %s1128_s14   ;;  %s901_s13 = sphi %s949_s13, %s1127_s13   ;;  %s897_s12 = sphi %s947_s12, %s1126_s12  }
   0x6   : > { %s29_s20 = sadd.s32 1, %s913_s16  ;;  %s108_s21 = sadd.s32 1, %s905_s14 }
   0x7   : > { %p31_p0 = scmp.ge.s32.totalorder %s29_s20, 2  ;;  %p118_p1 = scmp.ne.s32.totalorder %s905_s14, %s901_s13 }
   0x8   : > { %p119_p2 = scmp.eq.s32.totalorder %s623_s18, 1  ;;  %p124_p3 = scmp.ne.s32.totalorder %s901_s13, %s897_s12 }
   0x9   : > { %s1132_s20 = smov (%p31_p0, %s29_s20), 0  ;;  %p125_p5 = scmp.eq.s32.totalorder %s624_s19, 1 }
   0xa   : > { %p987_p4 = por %p119_p2, %p118_p1  ;;  %s103_s23 = ssub.s32 %s913_s16, %s1132_s20 }
   0xb   : > { %p625_p6 = scmp.ge.s32.totalorder %s917_s17, 1  ;;  %p106_p7 = scmp.eq.s32.totalorder %s103_s23, 0 }
   0xc   : > { %p994_p8 = por %p125_p5, %p124_p3  ;;  %p132_p9 = scmp.lt.s32.totalorder %s917_s17, 3 }
   0xd   : > { %s1000_s25 = scalar_select %p106_p7, %s905_s14, %s108_s21  }
   0xe   : > { %p1002_p10 = pnand %p625_p6, %p132_p9  ;;  %p1006_p11 = scmp.eq.s32.totalorder %s623_s18, 0 }
   0xf   : > { %s919_s28 = smov [#allocation2]  }
  0x10   : > { %p727_p12 = pneg %p1002_p10  ;;  %s144_s29 = sshll.u32 %s919_s28, 4  ;;  %s145_s29 = int_to_ptr.vmem [resolvable:$true] %s144_s29 }
  0x11   : > { %s822_s30 = scalar_lea.vmem %s145_s29, 1728  ;;  %p830_p5 = scmp.lt.s32.totalorder %s145_s29, %s145_s29 }
  0x12   : > { %p728_p13 = pnand %p1006_p11, %p727_p12  ;;  %p823_p1 = scmp.ne.s32.totalorder %s145_s29, %s822_s30 }
  0x13   : > { %p831_p6 = scmp.lt.s32.totalorder %s822_s30, %s822_s30 }
  0x14   : > { %p813_p0 = pneg %p728_p13 }
  0x15   : > { %p832_p7 = por %p831_p6, %p830_p5 }
  0x16   : > { %p825_p2 = pnand %p823_p1, %p813_p0 }
  0x18   : > { %p826_p3 = pneg %p825_p2 }
  0x1a   : > { %p833_p9 = pnand %p832_p7, %p826_p3 }
  0x1c   : > { %836 = shalt.err (!%p833_p9)
}
  0x1d   : > { %s920_s4 = smov 64   ;;  %s921_s5 = smov 4  }
  0x1e   : > { %730 = dma.hbm_to_vmem [thread:$0]  (!%p728_p13), %s1119_s1, 1728, %s145_s29, [#allocation3], %s920_s4, %s920_s4, %s921_s5  }
  0x1f   : > { %175 = sbr.rel (%p1002_p10) target bundleno = 296 (0x128), region = 32 }
  0x24   : > { %888 = dma.done.wait (%p1006_p11), [#allocation3], 1728  }
  0x25   : > { %890 = vsyncadd (%p1006_p11), [#allocation3], 4294965568  ;;  %v922_v0 = vmov 0.0   ;;  %p203_p12 = scmp.lt.s32.totalorder %s909_s15, 1  ;;  %vm923_vm0 = vmmov 0   ;;  %vm288_vm1 = vcmask 1043456  }
  0x26   : > { %678 = vmatprep.subr.bf16.mxu0 %v922_v0  ;;  %692 = vmatprep.subr.bf16.mxu1 %v922_v0  ;;  %v793_v1 = vld [vmem:[#allocation2 + $0x44] ss:$0 sps:$4 sm:$0xff]   ;;  %v794_v2 = vld [vmem:[#allocation2 + $0x20] ss:$0 sps:$4 sm:$0xff]   ;;  %v796_v6 = vld [vmem:[#allocation2 + $0x18] sm:$0xff]   ;;  %vm284_vm3 = vcmask 588800  }
  0x27   : > { %688 = vmatprep.mubr.msk.bf16.mxu0 %vm923_vm0, %v922_v0  ;;  %702 = vmatprep.mubr.msk.bf16.mxu1 %vm923_vm0, %v922_v0  ;;  %s204_s8 = scalar_select %p203_p12, %s909_s15, 1  ;;  %v290_v3 = vsel %vm288_vm1, %v793_v1, 0  ;;  %v363_v4 = vsel %vm288_vm1, %v794_v2, 0  ;;  %v795_v5 = vld [vmem:[#allocation2 + $0x3c] sm:$0xff]   ;;  %v797_v7 = vld [vmem:[#allocation2 + $0x34] sm:$0xff]   ;;  %v799_v13 = vld [vmem:[#allocation2 + $0x2c] sm:$0xff]  }
  0x28   : > { %679 = vmatpush3.bf16.msra.mxu0 %v290_v3  ;;  %693 = vmatpush3.bf16.msra.mxu1 %v363_v4  ;;  %v798_v8 = vld [vmem:[#allocation2 + $0x10] sm:$0xff]   ;;  %v800_v14 = vld [vmem:[#allocation2 + $0x8] sm:$0xff]   ;;  %v802_v21 = vld [vmem:[#allocation2] sm:$0xff]   ;;  %vm244_vm2 = vsmask.f32 7424  ;;  %vm420_vm4 = vcmask 1046528  }
  0x29   : > { %s720_s9 = smul.u32 12, %s204_s8  ;;  %680 = vmatprep.subr.bf16.mxu0 %v922_v0  ;;  %694 = vmatprep.subr.bf16.mxu1 %v922_v0  ;;  %v801_v19 = vld [vmem:[#allocation2 + $0x24] sm:$0xff]   ;;  %v807_v27 = vld [vmem:[#allocation2 + $0x58] sm:$0xff]   ;;  %v808_v29 = vld [vmem:[#allocation2 + $0x50] sm:$0xff]   ;;  %s200_s19 = sand.u32 1, %s901_s13  }
  0x2a   : > { %v805_v23 = vld [vmem:[#allocation2 + $0x68] ss:$0 sps:$4 sm:$0xff]   ;;  %v806_v26 = vld [vmem:[#allocation2 + $0x60] sm:$0xff]   ;;  %s630_s26 = sshll.u32 %s200_s19, 4  ;;  %s659_s29 = sshll.u32 %s909_s15, 8 }
  0x2b   : > { %s1038_s18 = scalar_lea.vmem %s1118_s0, %s720_s9  ;;  %v455_v25 = vsel %vm288_vm1, %v805_v23, 0  ;;  %v809_v31 = vld [vmem:[#allocation2 + $0x48] sm:$0xff]   ;;  %v653_v45 = vld [vmem:[%s1120_s2] ss:$0 sm:$0xff]  ;;  %s202_s27 = scalar_lea.vmem [#allocation5], %s630_s26 }
  0x2c   : > { %681 = vmatpush3.bf16.msra.mxu0 %v795_v5  ;;  %695 = vmatpush3.bf16.msra.mxu1 %v796_v6  ;;  %v214_v9 = vld [vmem:[%s1038_s18] sm:$0xf]  ;;  %v215_v10 = vld [vmem:[%s1038_s18 + $0x4] sm:$0xf]  ;;  %s529_s28 = sshll.u32 %s202_s27, 4  ;;  %s1071_s5 = scalar_lea.hbm %s1121_s3, %s659_s29  ;;  %s1066_s28 = int_to_ptr.vmem [resolvable:$true] %s529_s28 }
  0x2d   : > { %682 = vmatprep.subr.bf16.mxu0 %v922_v0  ;;  %696 = vmatprep.subr.bf16.mxu1 %v922_v0  ;;  %v632_v11 = vcombine.low %v214_v9, %v215_v10  ;;  %v804_v12 = vld [vmem:[%s1038_s18 + $0x8] ss:$0 sps:$4 sm:$0x11]   ;;  %v406_v28 = vld [vmem:[%s1038_s18] sm:$0xe]  ;;  %s1073_s6 = scalar_lea.sflag [#allocation4], %s200_s19 }
  0x2e   : > { %v253_v17 = vshll.u32 %v804_v12, 16  ;;  %v646_v30 = vcombine.low %v406_v28, %v215_v10  ;;  %v422_v33 = vrot.slane %v804_v12, 1  ;;  %s837_s7 = scalar_lea.vmem %s1066_s28, 256  ;;  %s924_s15 = smov [#allocation5]  }
  0x2f   : > { %v246_v15 = vshrl.u32 %v632_v11, 16  ;;  %v248_v16 = vshll.u32 %v632_v11, 16  ;;  %p838_p10 = scmp.ne.s32.totalorder %s1066_s28, %s837_s7  ;;  %s841_s8 = sshll.u32 %s924_s15, 4  ;;  %s842_s8 = int_to_ptr.vmem [resolvable:$false] %s841_s8 }
  0x30   : > { %683 = vmatpush3.bf16.msra.mxu0 %v797_v7  ;;  %697 = vmatpush3.bf16.msra.mxu1 %v798_v8  ;;  %v255_v20 = vrot.slane %v253_v17, 1  ;;  %v421_v32 = vrot.slane %v646_v30, 1  ;;  %s843_s9 = scalar_lea.vmem %s842_s8, 512  ;;  %p844_p0 = scmp.lt.s32.totalorder %s1066_s28, %s842_s8 }
  0x31   : > { %684 = vmatprep.subr.bf16.mxu0 %v922_v0  ;;  %698 = vmatprep.subr.bf16.mxu1 %v922_v0  ;;  %v250_v18 = vrot.slane %v248_v16, 1  ;;  %p839_p11 = pnand %p838_p10, %p987_p4  ;;  %p845_p1 = scmp.lt.s32.totalorder %s843_s9, %s837_s7 }
  0x32   : > { %v423_v34 = vsel %vm420_vm4, %v421_v32, %v422_v33 }
  0x33   : > { %v251_v22 = vor.u32 %v250_v18, %v246_v15  ;;  %p840_p13 = pneg %p839_p11  ;;  %p846_p2 = por %p845_p1, %p844_p0 }
  0x34   : > { %685 = vmatpush3.bf16.msra.mxu0 %v799_v13  ;;  %699 = vmatpush3.bf16.msra.mxu1 %v800_v14 }
  0x35   : > { %686 = vmatprep.subr.bf16.mxu0 %v922_v0  ;;  %700 = vmatprep.subr.bf16.mxu1 %v922_v0  ;;  %v256_v24 = vsel %vm244_vm2, %v251_v22, %v255_v20  ;;  %p847_p3 = pnand %p846_p2, %p840_p13 }
  0x38   : > { %687 = vmatpush3.bf16.msra.mxu0 %v801_v19  ;;  %701 = vmatpush3.bf16.msra.mxu1 %v802_v21 }
  0x39   : > { %706 = vmatprep.subr.bf16.mxu0 %v922_v0 }
  0x3b   : > { %689 = vmatmul.mubr.msk.bf16.vlgmr.msra.gmra.mxu0 %vm284_vm3, %v256_v24  ;;  %703 = vmatmul.mubr.msk.bf16.vlgmr.msra.gmra.mxu1 %vm284_vm3, %v632_v11 }
  0x3c   : > { %707 = vmatpush3.bf16.msra.mxu0 %v455_v25  ;;  %716 = vmatprep.mubr.msk.bf16.mxu0 %vm923_vm0, %v922_v0 }
  0x3d   : > { %708 = vmatprep.subr.bf16.mxu0 %v922_v0 }
  0x40   : > { %709 = vmatpush3.bf16.msra.mxu0 %v806_v26 }
  0x41   : > { %710 = vmatprep.subr.bf16.mxu0 %v922_v0 }
  0x44   : > { %711 = vmatpush3.bf16.msra.mxu0 %v807_v27 }
  0x45   : > { %712 = vmatprep.subr.bf16.mxu0 %v922_v0 }
  0x48   : > { %713 = vmatpush3.bf16.msra.mxu0 %v808_v29 }
  0x49   : > { %714 = vmatprep.subr.bf16.mxu0 %v922_v0 }
  0x4c   : > { %715 = vmatpush3.bf16.msra.mxu0 %v809_v31 }
  0x4f   : > { %717 = vmatmul.mubr.msk.bf16.vlgmr.msra.gmra.mxu0 %vm284_vm3, %v423_v34 }
  0xfb   : > { %v326_v35 = vpop.f32.mrf.mxu0  ;;  %v399_v36 = vpop.f32.mrf.mxu1 }
  0xfc   : > { %v400_v43 = vadd.f32 %v399_v36, %v326_v35 }
  0xfd   : > { %v690_v37 = vpop.f32.mrf.mxu0  ;;  %v704_v38 = vpop.f32.mrf.mxu1 }
  0xff   : > { %v329_v39 = vpop.f32.mrf.mxu0  ;;  %v402_v40 = vpop.f32.mrf.mxu1 }
 0x100   : > { %v403_v48 = vadd.f32 %v402_v40, %v329_v39 }
 0x101   : > { %v691_v41 = vpop.f32.mrf.mxu0  ;;  %v705_v42 = vpop.f32.mrf.mxu1 }
 0x10f   : > { %v491_v44 = vpop.f32.mrf.mxu0 }
 0x110   : > { %v498_v46 = vadd.f32 %v491_v44, %v400_v43 }
 0x111   : > { %v718_v47 = vpop.f32.mrf.mxu0 }
 0x112   : > { %v507_v49 = vadd.f32 %v653_v45, %v498_v46 }
 0x113   : > { %v494_v50 = vpop.f32.mrf.mxu0 }
 0x114   : > { %v509_v51 = vmax.f32 %v507_v49, 0.0  ;;  %v499_v52 = vadd.f32 %v494_v50, %v403_v48 }
 0x115   : > { %v719_v53 = vpop.f32.mrf.mxu0 }
 0x116   : > { %511 = vst [vmem:[%s202_s27] sm:$0xff] %v509_v51  ;;  %v508_v54 = vadd.f32 %v653_v45, %v499_v52 }
 0x118   : > { %v510_v55 = vmax.f32 %v508_v54, 0.0 }
 0x11a   : > { %512 = vst [vmem:[%s202_s27 + $0x8] sm:$0xff] %v510_v55 }
 0x11b   : > { %850 = shalt.err (!%p847_p3)
}
 0x11c   : > { %s851_s10 = scalar_lea.hbm %s1071_s5, 256  ;;  %s855_s19 = scalar_lea.hbm %s1121_s3, 512 }
 0x11d   : > { %p852_p5 = scmp.ne.s32.totalorder %s1071_s5, %s851_s10  ;;  %p856_p9 = scmp.lt.s32.totalorder %s1071_s5, %s1121_s3 }
 0x11e   : > { %p857_p12 = scmp.lt.s32.totalorder %s855_s19, %s851_s10 }
 0x11f   : > { %p853_p6 = pnand %p852_p5, %p987_p4 }
 0x120   : > { %p858_p10 = por %p857_p12, %p856_p9 }
 0x121   : > { %p854_p7 = pneg %p853_p6 }
 0x123   : > { %p859_p11 = pnand %p858_p10, %p854_p7 }
 0x125   : > { %862 = shalt.err (!%p859_p11)
}
 0x126   : > { %s925_s26 = smov 128   ;;  %s926_s27 = smov 8  }
 0x127   : > { %725 = dma.vmem_to_hbm [thread:$0]  (%p987_p4), %s1066_s28, 256, %s1071_s5, %s1073_s6, %s925_s26, %s925_s26, %s926_s27  }
 0x128 PF: > { %p737_p13 = scmp.ge.s32.totalorder %s917_s17, 2  ;;  %s544_s29 = sand.u32 1, %s897_s12  }
 0x129   : > { %s545_s30 = scalar_lea.sflag [#allocation4], %s544_s29 }
 0x12a   : > { %p732_p0 = pnand %p737_p13, %p994_p8 }
 0x12c   : > { %p733_p1 = pneg %p732_p0 }
 0x12e   : > { %892 = dma.done.wait (%p733_p1), %s545_s30, 256  }
 0x12f   : > { %894 = vsyncadd (%p733_p1), %s545_s30, 4294967040  ;;  %s17_s17 = sadd.s32 1, %s917_s17   ;;  %s1126_s12 = smov %s901_s13 }
 0x130   : > { %p14_p2 = scmp.ge.s32.totalorder %s17_s17, 4   ;;  %s1127_s13 = smov %s905_s14 }
 0x131   : > { %s1128_s14 = smov %s1000_s25  ;;  %s1129_s15 = smov %s913_s16 }
 0x132   : > { %s1130_s16 = smov %s1132_s20  ;;  %16 = sbr.rel (!%p14_p2) target bundleno = 5 (0x5), region = 74 }
 0x137   :  { %550 = vsyncpa [#allocation3], 1 }
 0x138   :  { %552 = vsyncpa [#allocation3 + $0x1], 1 }
 0x139   :  { %553 = vsyncpa [#allocation4], 1 }
 0x13a   :  { %555 = vsyncpa [#allocation4 + $0x1], 1 }

</bundles_post_ra>
